<compile_context>
chip_gen: v6e
topology: v6e:2x2x1
jax: 0.10.0
libtpu: 0.0.40
codegen_flags: <defaults>
</compile_context>

<pallas_src>
import functools

import jax
import jax.numpy as jnp
from jax.experimental import pallas as pl
from jax.experimental.pallas import tpu as pltpu

EPSILON = 1e-07
_LANES = 128


def _round_up(x, k):
    return ((x + k - 1) // k) * k


def _f1_partials_kernel(pred_ref, lab_ref, tp_ref, sp_ref, cy_ref, *,
                        n_valid, n_classes):
    """Accumulates per-class partial sums for the soft-F1 statistics.

    pred_ref : (C, R, 128) logits block (class-major; 128 samples per lane row)
    lab_ref  : (R, 128) int32 class ids
    tp/sp/cy : (1, C, 128) float32 per-core lane-wise accumulators (resident
               output blocks, revisited across the "arbitrary" step axis)
    """
    core = pl.program_id(0)
    step = pl.program_id(1)

    @pl.when(step == 0)
    def _init():
        tp_ref[...] = jnp.zeros_like(tp_ref)
        sp_ref[...] = jnp.zeros_like(sp_ref)
        cy_ref[...] = jnp.zeros_like(cy_ref)

    labels = lab_ref[...]                                    # (R, 128) int32
    r = labels.shape[0]

    # Global sample index of every element in this block -> validity mask
    # (padded tail samples must not contribute to the statistics).
    sub = jax.lax.broadcasted_iota(jnp.int32, (r, _LANES), 0)
    lane = jax.lax.broadcasted_iota(jnp.int32, (r, _LANES), 1)
    row = (core * pl.num_programs(1) + step) * r + sub
    valid = (row * _LANES + lane) < n_valid                  # (R, 128) bool
    validf = valid.astype(jnp.float32)

    if n_classes == 2:
        # Softmax over two classes == sigmoid of the logit difference:
        # one exp per sample, no row-max / row-sum.
        z0 = pred_ref[0].astype(jnp.float32)
        z1 = pred_ref[1].astype(jnp.float32)
        p1 = pl.reciprocal(1.0 + jnp.exp(z0 - z1), approx=False)
        probs = [1.0 - p1, p1]
    else:
        z = pred_ref[...].astype(jnp.float32)                # (C, R, 128)
        e = jnp.exp(z - jnp.max(z, axis=0, keepdims=True))
        inv = pl.reciprocal(jnp.sum(e, axis=0, keepdims=True), approx=False)[0]
        probs = [e[k] * inv for k in range(n_classes)]

    # Per-class lane-wise partial sums: only sublane-axis reductions here; the
    # single cross-lane reduction happens once in the tiny JAX epilogue.
    tp_upd, sp_upd, cy_upd = [], [], []
    for k in range(n_classes):
        y_k = jnp.where((labels == k) & valid, 1.0, 0.0)     # masked one-hot
        p_k = probs[k] * validf                              # masked probability
        tp_upd.append(jnp.sum(y_k * p_k, axis=0, keepdims=True))   # (1, 128)
        sp_upd.append(jnp.sum(p_k, axis=0, keepdims=True))
        cy_upd.append(jnp.sum(y_k, axis=0, keepdims=True))

    tp_ref[...] += jnp.concatenate(tp_upd, axis=0)[None]     # (1, C, 128)
    sp_ref[...] += jnp.concatenate(sp_upd, axis=0)[None]
    cy_ref[...] += jnp.concatenate(cy_upd, axis=0)[None]


def _default_block_rows(m, c):
    # ~6 MiB of real payload (f32 logits + i32 labels) per grid step: amortizes the
    # ~0.35us/step grid overhead while double-buffered inputs + elementwise
    # temporaries stay well inside scoped VMEM on v5e/v6e/v7x.
    bytes_per_row = _LANES * 4 * (c + 1)
    r = (6 * 1024 * 1024) // bytes_per_row
    r = min(r, _round_up(m, 8))
    return max(8, (r // 8) * 8)


@functools.partial(jax.jit, static_argnames=("classes", "epsilon", "block_rows"))
def f1_loss_2(y_pred, y_true, classes=2, epsilon=EPSILON, block_rows=None):
    """y_pred: (N, C) float logits, y_true: (N,) int labels. Returns scalar loss."""
    assert y_pred.ndim == 2 and y_true.ndim == 1
    n, c = y_pred.shape
    assert c == classes and y_true.shape[0] == n

    m = pl.cdiv(n, _LANES)                      # number of 128-sample lane rows
    if block_rows is None:
        block_rows = _default_block_rows(m, c)
    r = max(8, (int(block_rows) // 8) * 8)      # sublane-aligned rows per grid step

    blocks = pl.cdiv(m, r)
    num_cores = 2 if blocks >= 2 else 1         # v7x: split batch over both TCs
    spc = pl.cdiv(blocks, num_cores)            # grid steps per core
    rows_pad = num_cores * spc * r
    n_pad = rows_pad * _LANES

    # Lane/sublane-dense layout: class-major (C, M, 128) logits, (M, 128) labels.
    # The relayout fuses under jit; allow_input_fusion lets XLA fuse it into the
    # kernel's input DMA instead of materializing an extra HBM pass.
    pred = jnp.transpose(y_pred)                # (C, N)
    lab = y_true.astype(jnp.int32)
    if n_pad != n:
        pred = jnp.pad(pred, ((0, 0), (0, n_pad - n)))
        lab = jnp.pad(lab, (0, n_pad - n))
    pred = pred.reshape(c, rows_pad, _LANES)
    lab = lab.reshape(rows_pad, _LANES)

    kernel = functools.partial(_f1_partials_kernel, n_valid=n, n_classes=c)
    part = jax.ShapeDtypeStruct((num_cores, c, _LANES), jnp.float32)

    tp_p, sp_p, cy_p = pl.pallas_call(
        kernel,
        out_shape=(part, part, part),
        grid_spec=pltpu.PrefetchScalarGridSpec(
            num_scalar_prefetch=0,
            grid=(num_cores, spc),
            in_specs=[
                pl.BlockSpec((c, r, _LANES), lambda cc, s: (0, cc * spc + s, 0)),
                pl.BlockSpec((r, _LANES), lambda cc, s: (cc * spc + s, 0)),
            ],
            out_specs=[
                pl.BlockSpec((1, c, _LANES), lambda cc, s: (cc, 0, 0)),
                pl.BlockSpec((1, c, _LANES), lambda cc, s: (cc, 0, 0)),
                pl.BlockSpec((1, c, _LANES), lambda cc, s: (cc, 0, 0)),
            ],
        ),
        compiler_params=pltpu.CompilerParams(
            dimension_semantics=("parallel", "arbitrary"),
            vmem_limit_bytes=48 * 1024 * 1024,
            allow_input_fusion=[True, True],
        ),
    )(pred, lab)

    # O(C) epilogue: combine per-core lane-wise partials and form the loss
    # (tn is unused by the reference forward).
    tp = jnp.sum(tp_p, axis=(0, 2))             # true positives, per class
    sp = jnp.sum(sp_p, axis=(0, 2))             # sum of probabilities, per class
    cy = jnp.sum(cy_p, axis=(0, 2))             # label counts, per class
    fp = sp - tp                                # sum((1-y)*p)  == sum(p) - tp
    fn = cy - tp                                # sum(y*(1-p))  == count(y) - tp
    precision = tp / (tp + fp + epsilon)
    recall = tp / (tp + fn + epsilon)
    f1 = 2.0 * precision * recall / (precision + recall + epsilon)
    f1 = jnp.clip(f1, epsilon, 1.0 - epsilon)
    return 1.0 - jnp.mean(f1)


def _f1_loss_ref(y_pred, y_true, classes=2, epsilon=EPSILON):
    # pure-JAX reference mirroring the PyTorch forward
    y_oh = jax.nn.one_hot(y_true, classes, dtype=jnp.float32)
    p = jax.nn.softmax(y_pred.astype(jnp.float32), axis=1)
    tp = jnp.sum(y_oh * p, axis=0)
    fp = jnp.sum((1.0 - y_oh) * p, axis=0)
    fn = jnp.sum(y_oh * (1.0 - p), axis=0)
    precision = tp / (tp + fp + epsilon)
    recall = tp / (tp + fn + epsilon)
    f1 = 2.0 * precision * recall / (precision + recall + epsilon)
    f1 = jnp.clip(f1, epsilon, 1.0 - epsilon)
    return 1.0 - jnp.mean(f1)


if __name__ == "__main__":
    key = jax.random.PRNGKey(0)
    k1, k2, k3, k4 = jax.random.split(key, 4)

    # Binary case: block_rows=8 forces a (2 cores x 2 steps) grid -> exercises the
    # multi-step accumulation, the per-core partial outputs and the tail masking.
    n, c = 2500, 2
    y_pred = jax.random.normal(k1, (n, c), dtype=jnp.float32)
    y_true = jax.random.randint(k2, (n,), 0, c, dtype=jnp.int32)
    loss = jax.block_until_ready(f1_loss_2(y_pred, y_true, classes=c, block_rows=8))
    ref = _f1_loss_ref(y_pred, y_true, classes=c)
    assert jnp.allclose(loss, ref, atol=1e-5, rtol=1e-5), (loss, ref)

    # Multi-class (softmax) path, single grid step.
    n2, c2 = 700, 3
    y_pred2 = jax.random.normal(k3, (n2, c2), dtype=jnp.float32)
    y_true2 = jax.random.randint(k4, (n2,), 0, c2, dtype=jnp.int32)
    loss2 = jax.block_until_ready(f1_loss_2(y_pred2, y_true2, classes=c2))
    ref2 = _f1_loss_ref(y_pred2, y_true2, classes=c2)
    assert jnp.allclose(loss2, ref2, atol=1e-5, rtol=1e-5), (loss2, ref2)

    print("KERNEL_OK")
</pallas_src>

<mosaic_0001>
module attributes {stable_mosaic.version = 11 : i64} {
  func.func @_f1_partials_kernel(%arg0: i32, %arg1: i32, %arg2: memref<2x8x128xf32, #tpu.memory_space<vmem>>, %arg3: memref<8x128xi32, #tpu.memory_space<vmem>>, %arg4: memref<1x2x128xf32, #tpu.memory_space<vmem>>, %arg5: memref<1x2x128xf32, #tpu.memory_space<vmem>>, %arg6: memref<1x2x128xf32, #tpu.memory_space<vmem>>) attributes {dimension_semantics = [#tpu.dimension_semantics<parallel>, #tpu.dimension_semantics<arbitrary>], iteration_bounds = array<i64: 2, 2>, scalar_prefetch = 0 : i64, scratch_operands = 0 : i64, tpu.core_type = #tpu.core_type<tc>, window_params = [{transform_indices = @transform_0, window_bounds = array<i64: 2, 8, 128>}, {transform_indices = @transform_1, window_bounds = array<i64: 8, 128>}, {transform_indices = @transform_2, window_bounds = array<i64: 1, 2, 128>}, {transform_indices = @transform_3, window_bounds = array<i64: 1, 2, 128>}, {transform_indices = @transform_4, window_bounds = array<i64: 1, 2, 128>}]} {
    %c0_i32 = arith.constant 0 : i32
    %0 = arith.cmpi eq, %arg1, %c0_i32 : i32
    %1 = arith.extui %0 : i1 to i32
    %c0_i32_0 = arith.constant 0 : i32
    %2 = arith.cmpi ne, %1, %c0_i32_0 : i32
    scf.if %2 {
      %cst_37 = arith.constant 0.000000e+00 : f32
      %72 = vector.broadcast %cst_37 : f32 to vector<1x2x128xf32>
      %c0_38 = arith.constant 0 : index
      %c0_39 = arith.constant 0 : index
      %c0_40 = arith.constant 0 : index
      %73 = vector.load %arg4[%c0_38, %c0_39, %c0_40] : memref<1x2x128xf32, #tpu.memory_space<vmem>>, vector<1x2x128xf32>
      tpu.vector_store %arg4[%c0_38, %c0_39, %c0_40], %72 {strides = array<i32>} : memref<1x2x128xf32, #tpu.memory_space<vmem>>, vector<1x2x128xf32>,
      %cst_41 = arith.constant 0.000000e+00 : f32
      %74 = vector.broadcast %cst_41 : f32 to vector<1x2x128xf32>
      %c0_42 = arith.constant 0 : index
      %c0_43 = arith.constant 0 : index
      %c0_44 = arith.constant 0 : index
      %75 = vector.load %arg5[%c0_42, %c0_43, %c0_44] : memref<1x2x128xf32, #tpu.memory_space<vmem>>, vector<1x2x128xf32>
      tpu.vector_store %arg5[%c0_42, %c0_43, %c0_44], %74 {strides = array<i32>} : memref<1x2x128xf32, #tpu.memory_space<vmem>>, vector<1x2x128xf32>,
      %cst_45 = arith.constant 0.000000e+00 : f32
      %76 = vector.broadcast %cst_45 : f32 to vector<1x2x128xf32>
      %c0_46 = arith.constant 0 : index
      %c0_47 = arith.constant 0 : index
      %c0_48 = arith.constant 0 : index
      %77 = vector.load %arg6[%c0_46, %c0_47, %c0_48] : memref<1x2x128xf32, #tpu.memory_space<vmem>>, vector<1x2x128xf32>
      tpu.vector_store %arg6[%c0_46, %c0_47, %c0_48], %76 {strides = array<i32>} : memref<1x2x128xf32, #tpu.memory_space<vmem>>, vector<1x2x128xf32>,
    } else {
    }
    %c0 = arith.constant 0 : index
    %c0_1 = arith.constant 0 : index
    %3 = vector.load %arg3[%c0, %c0_1] : memref<8x128xi32, #tpu.memory_space<vmem>>, vector<8x128xi32>
    %4 = tpu.iota {dimensions = array<i32: 0>} : vector<8x128xi32>
    %5 = tpu.iota {dimensions = array<i32: 1>} : vector<8x128xi32>
    %c2_i32 = arith.constant 2 : i32
    %6 = arith.muli %arg0, %c2_i32 : i32
    %7 = arith.addi %6, %arg1 : i32
    %c8_i32 = arith.constant 8 : i32
    %8 = arith.muli %7, %c8_i32 : i32
    %9 = vector.broadcast %8 : i32 to vector<8x128xi32>
    %10 = arith.addi %9, %4 : vector<8x128xi32>
    %c128_i32 = arith.constant 128 : i32
    %11 = vector.broadcast %c128_i32 : i32 to vector<8x128xi32>
    %12 = arith.muli %10, %11 : vector<8x128xi32>
    %13 = arith.addi %12, %5 : vector<8x128xi32>
    %c2500_i32 = arith.constant 2500 : i32
    %14 = vector.broadcast %c2500_i32 : i32 to vector<8x128xi32>
    %15 = arith.cmpi slt, %13, %14 : vector<8x128xi32>
    %16 = arith.extui %15 : vector<8x128xi1> to vector<8x128xi32>
    %17 = arith.sitofp %16 : vector<8x128xi32> to vector<8x128xf32>
    %c0_2 = arith.constant 0 : index
    %c0_3 = arith.constant 0 : index
    %c0_4 = arith.constant 0 : index
    %18 = vector.load %arg2[%c0_2, %c0_3, %c0_4] : memref<2x8x128xf32, #tpu.memory_space<vmem>>, vector<1x8x128xf32>
    %19 = vector.shape_cast %18 : vector<1x8x128xf32> to vector<8x128xf32>
    %c1 = arith.constant 1 : index
    %c0_5 = arith.constant 0 : index
    %c0_6 = arith.constant 0 : index
    %20 = vector.load %arg2[%c1, %c0_5, %c0_6] : memref<2x8x128xf32, #tpu.memory_space<vmem>>, vector<1x8x128xf32>
    %21 = vector.shape_cast %20 : vector<1x8x128xf32> to vector<8x128xf32>
    %22 = arith.subf %19, %21 : vector<8x128xf32>
    %23 = math.exp %22 : vector<8x128xf32>
    %cst = arith.constant 1.000000e+00 : f32
    %24 = vector.broadcast %cst : f32 to vector<8x128xf32>
    %25 = arith.addf %24, %23 : vector<8x128xf32>
    %26 = tpu.reciprocal %25 : vector<8x128xf32> -> vector<8x128xf32>
    %cst_7 = arith.constant 1.000000e+00 : f32
    %27 = vector.broadcast %cst_7 : f32 to vector<8x128xf32>
    %28 = arith.subf %27, %26 : vector<8x128xf32>
    %c0_i32_8 = arith.constant 0 : i32
    %29 = vector.broadcast %c0_i32_8 : i32 to vector<8x128xi32>
    %30 = arith.cmpi eq, %3, %29 : vector<8x128xi32>
    %31 = arith.andi %30, %15 : vector<8x128xi1>
    %cst_9 = arith.constant 1.000000e+00 : f32
    %cst_10 = arith.constant 0.000000e+00 : f32
    %32 = vector.broadcast %cst_9 : f32 to vector<8x128xf32>
    %33 = vector.broadcast %cst_10 : f32 to vector<8x128xf32>
    %34 = arith.select %31, %32, %33 : vector<8x128xi1>, vector<8x128xf32>
    %35 = arith.mulf %28, %17 : vector<8x128xf32>
    %36 = arith.mulf %34, %35 : vector<8x128xf32>
    %cst_11 = arith.constant dense<0.000000e+00> : vector<128xf32>
    %37 = vector.multi_reduction <add>, %36, %cst_11 [0] : vector<8x128xf32> to vector<128xf32>
    %38 = vector.shape_cast %37 : vector<128xf32> to vector<1x128xf32>
    %cst_12 = arith.constant dense<0.000000e+00> : vector<128xf32>
    %39 = vector.multi_reduction <add>, %35, %cst_12 [0] : vector<8x128xf32> to vector<128xf32>
    %40 = vector.shape_cast %39 : vector<128xf32> to vector<1x128xf32>
    %cst_13 = arith.constant dense<0.000000e+00> : vector<128xf32>
    %41 = vector.multi_reduction <add>, %34, %cst_13 [0] : vector<8x128xf32> to vector<128xf32>
    %42 = vector.shape_cast %41 : vector<128xf32> to vector<1x128xf32>
    %c1_i32 = arith.constant 1 : i32
    %43 = vector.broadcast %c1_i32 : i32 to vector<8x128xi32>
    %44 = arith.cmpi eq, %3, %43 : vector<8x128xi32>
    %45 = arith.andi %44, %15 : vector<8x128xi1>
    %cst_14 = arith.constant 1.000000e+00 : f32
    %cst_15 = arith.constant 0.000000e+00 : f32
    %46 = vector.broadcast %cst_14 : f32 to vector<8x128xf32>
    %47 = vector.broadcast %cst_15 : f32 to vector<8x128xf32>
    %48 = arith.select %45, %46, %47 : vector<8x128xi1>, vector<8x128xf32>
    %49 = arith.mulf %26, %17 : vector<8x128xf32>
    %50 = arith.mulf %48, %49 : vector<8x128xf32>
    %cst_16 = arith.constant dense<0.000000e+00> : vector<128xf32>
    %51 = vector.multi_reduction <add>, %50, %cst_16 [0] : vector<8x128xf32> to vector<128xf32>
    %52 = vector.shape_cast %51 : vector<128xf32> to vector<1x128xf32>
    %cst_17 = arith.constant dense<0.000000e+00> : vector<128xf32>
    %53 = vector.multi_reduction <add>, %49, %cst_17 [0] : vector<8x128xf32> to vector<128xf32>
    %54 = vector.shape_cast %53 : vector<128xf32> to vector<1x128xf32>
    %cst_18 = arith.constant dense<0.000000e+00> : vector<128xf32>
    %55 = vector.multi_reduction <add>, %48, %cst_18 [0] : vector<8x128xf32> to vector<128xf32>
    %56 = vector.shape_cast %55 : vector<128xf32> to vector<1x128xf32>
    %c0_19 = arith.constant 0 : index
    %c0_20 = arith.constant 0 : index
    %c0_21 = arith.constant 0 : index
    %57 = vector.load %arg4[%c0_19, %c0_20, %c0_21] : memref<1x2x128xf32, #tpu.memory_space<vmem>>, vector<1x2x128xf32>
    %58 = tpu.concatenate %38, %52 in 0 : vector<1x128xf32>, vector<1x128xf32> -> vector<2x128xf32>
    %59 = vector.shape_cast %58 : vector<2x128xf32> to vector<1x2x128xf32>
    %60 = arith.addf %57, %59 : vector<1x2x128xf32>
    %c0_22 = arith.constant 0 : index
    %c0_23 = arith.constant 0 : index
    %c0_24 = arith.constant 0 : index
    %61 = vector.load %arg4[%c0_22, %c0_23, %c0_24] : memref<1x2x128xf32, #tpu.memory_space<vmem>>, vector<1x2x128xf32>
    tpu.vector_store %arg4[%c0_22, %c0_23, %c0_24], %60 {strides = array<i32>} : memref<1x2x128xf32, #tpu.memory_space<vmem>>, vector<1x2x128xf32>,
    %c0_25 = arith.constant 0 : index
    %c0_26 = arith.constant 0 : index
    %c0_27 = arith.constant 0 : index
    %62 = vector.load %arg5[%c0_25, %c0_26, %c0_27] : memref<1x2x128xf32, #tpu.memory_space<vmem>>, vector<1x2x128xf32>
    %63 = tpu.concatenate %40, %54 in 0 : vector<1x128xf32>, vector<1x128xf32> -> vector<2x128xf32>
    %64 = vector.shape_cast %63 : vector<2x128xf32> to vector<1x2x128xf32>
    %65 = arith.addf %62, %64 : vector<1x2x128xf32>
    %c0_28 = arith.constant 0 : index
    %c0_29 = arith.constant 0 : index
    %c0_30 = arith.constant 0 : index
    %66 = vector.load %arg5[%c0_28, %c0_29, %c0_30] : memref<1x2x128xf32, #tpu.memory_space<vmem>>, vector<1x2x128xf32>
    tpu.vector_store %arg5[%c0_28, %c0_29, %c0_30], %65 {strides = array<i32>} : memref<1x2x128xf32, #tpu.memory_space<vmem>>, vector<1x2x128xf32>,
    %c0_31 = arith.constant 0 : index
    %c0_32 = arith.constant 0 : index
    %c0_33 = arith.constant 0 : index
    %67 = vector.load %arg6[%c0_31, %c0_32, %c0_33] : memref<1x2x128xf32, #tpu.memory_space<vmem>>, vector<1x2x128xf32>
    %68 = tpu.concatenate %42, %56 in 0 : vector<1x128xf32>, vector<1x128xf32> -> vector<2x128xf32>
    %69 = vector.shape_cast %68 : vector<2x128xf32> to vector<1x2x128xf32>
    %70 = arith.addf %67, %69 : vector<1x2x128xf32>
    %c0_34 = arith.constant 0 : index
    %c0_35 = arith.constant 0 : index
    %c0_36 = arith.constant 0 : index
    %71 = vector.load %arg6[%c0_34, %c0_35, %c0_36] : memref<1x2x128xf32, #tpu.memory_space<vmem>>, vector<1x2x128xf32>
    tpu.vector_store %arg6[%c0_34, %c0_35, %c0_36], %70 {strides = array<i32>} : memref<1x2x128xf32, #tpu.memory_space<vmem>>, vector<1x2x128xf32>,
    return
  }
  func.func @transform_0(%arg0: i32, %arg1: i32) -> (i32, i32, i32) {
    %c2_i32 = arith.constant 2 : i32
    %0 = arith.muli %arg0, %c2_i32 : i32
    %1 = arith.addi %0, %arg1 : i32
    %c0_i32 = arith.constant 0 : i32
    %c0_i32_0 = arith.constant 0 : i32
    %c0_i32_1 = arith.constant 0 : i32
    return %c0_i32, %1, %c0_i32_0 : i32, i32, i32
  }
  func.func @transform_1(%arg0: i32, %arg1: i32) -> (i32, i32) {
    %c2_i32 = arith.constant 2 : i32
    %0 = arith.muli %arg0, %c2_i32 : i32
    %1 = arith.addi %0, %arg1 : i32
    %c0_i32 = arith.constant 0 : i32
    %c0_i32_0 = arith.constant 0 : i32
    return %1, %c0_i32 : i32, i32
  }
  func.func @transform_2(%arg0: i32, %arg1: i32) -> (i32, i32, i32) {
    %c0_i32 = arith.constant 0 : i32
    %c0_i32_0 = arith.constant 0 : i32
    %c0_i32_1 = arith.constant 0 : i32
    return %arg0, %c0_i32, %c0_i32_0 : i32, i32, i32
  }
  func.func @transform_3(%arg0: i32, %arg1: i32) -> (i32, i32, i32) {
    %c0_i32 = arith.constant 0 : i32
    %c0_i32_0 = arith.constant 0 : i32
    %c0_i32_1 = arith.constant 0 : i32
    return %arg0, %c0_i32, %c0_i32_0 : i32, i32, i32
  }
  func.func @transform_4(%arg0: i32, %arg1: i32) -> (i32, i32, i32) {
    %c0_i32 = arith.constant 0 : i32
    %c0_i32_0 = arith.constant 0 : i32
    %c0_i32_1 = arith.constant 0 : i32
    return %arg0, %c0_i32, %c0_i32_0 : i32, i32, i32
  }
}

</mosaic_0001>

<bundles_post_ra>
// kernel: f1_loss_2.2
= control target key start
LH: loop header
LB: loop body
LE: loop exit
PB: predicated region body
PF: predicated region fallthrough
CT: control target
= control target key end

     0   :  { %s704_s20 = smov 0   ;;  %s706_s21 = smov 0   ;;  %s806_s0 = inlined_call_operand.vmem [shape: f32[1,2,32,128], index: 0, kind: input, shape index: {}]   ;;  %s807_s1 = inlined_call_operand.vmem [shape: s32[2500], index: 1, kind: input, shape index: {}]   ;;  %s808_s2 = inlined_call_operand.<no memory space> [shape: s32[], index: 2, kind: input, shape index: {}]   ;;  %s809_s3 = inlined_call_operand.vmem [shape: f32[2,2,128], index: 3, kind: output, shape index: {0}]   ;;  %s810_s4 = inlined_call_operand.vmem [shape: f32[2,2,128], index: 4, kind: output, shape index: {1}]   ;;  %s811_s5 = inlined_call_operand.vmem [shape: f32[2,2,128], index: 5, kind: output, shape index: {2}]  }
   0x1   :  { %v11_v0 = vstv %s808_s2  ;;  %s708_s22 = smov 0   ;;  %s710_s23 = smov 0  }
   0x2   :  { %s712_s24 = smov 0  }
   0x3 LB: > { %s26_s25 = sadd.s32 1, %s659_s22  ;;  %s29_s26 = sadd.s32 1, %s663_s23  ;;  %s667_s24 = sphi %s712_s24, %s17_s24   ;;  %s663_s23 = sphi %s710_s23, %s815_s23   ;;  %s659_s22 = sphi %s708_s22, %s814_s22   ;;  %s655_s21 = sphi %s706_s21, %s813_s21   ;;  %s651_s20 = sphi %s704_s20, %s812_s20  }
   0x4   : > { %p27_p0 = scmp.ge.s32.totalorder %s26_s25, 2  ;;  %p566_p1 = scmp.ge.s32.totalorder %s667_s24, 1 }
   0x5   : > { %p217_p2 = scmp.lt.s32.totalorder %s667_s24, 5 }
   0x6   : > { %s817_s25 = smov (%p27_p0, %s26_s25), 0  ;;  %s819_s26 = smov (!%p27_p0, %s29_s26), %s663_s23 }
   0x7   : > { %p218_p3 = pnand %p566_p1, %p217_p2  ;;  %p31_p4 = scmp.ge.s32.totalorder %s819_s26, 2 }
   0x9   : > { %s821_s26 = smov (%p31_p4, %s819_s26), 0  ;;  %221 = sbr.rel (%p218_p3) target bundleno = 92 (0x5c), region = 28 }
   0xe   : > { %s567_s27 = sshll.u32 %s655_s21, 1  ;;  %p291_p5 = scmp.lt.s32.totalorder %s655_s21, 1  ;;  %v322_v3 = vlaneseq }
   0xf   : > { %s737_s28 = sadd.s32 %s651_s20, %s567_s27  ;;  %p577_p9 = scmp.ne.s32.totalorder %s651_s20, 0 }
  0x10   : > { %p265_p6 = scmp.lt.s32.totalorder %s737_s28, 3  ;;  %p279_p7 = scmp.lt.s32.totalorder %s737_s28, 2 }
  0x11   : > { %s823_s21 = smov (!%p291_p5, %s655_s21), 1  ;;  %s313_s27 = ssub.s32 2, %s737_s28 }
  0x12   : > { %s266_s29 = scalar_select %p265_p6, %s737_s28, 3  ;;  %v318_v4 = vstv %s313_s27 }
  0x13   : > { %s280_s30 = scalar_select %p279_p7, %s737_s28, 2  ;;  %vm319_vm0 = vcmp.lt.s32.totalorder %v318_v4, 0 }
  0x14   : > { %s568_s6 = sshll.u32 %s266_s29, 3  ;;  %s572_s7 = sshll.u32 %s823_s21, 1 }
  0x15   : > { %s268_s10 = scalar_lea.vmem %s806_s0, %s568_s6  ;;  %s570_s11 = sshll.u32 %s280_s30, 3 }
  0x16   : > { %s749_s14 = scalar_lea.vmem %s809_s3, %s572_s7  ;;  %v303_v1 = vld [vmem:[%s268_s10] sm:$0xff]  ;;  %s754_s17 = scalar_lea.vmem %s810_s4, %s572_s7 }
  0x17   : > { %v575_v2 = vld [vmem:[%s268_s10 + $0x20] sm:$0xff]  ;;  %s759_s21 = scalar_lea.vmem %s811_s5, %s572_s7  ;;  %306 = vst [vmem:[#allocation7] sm:$0xff] %v303_v1  ;;  %s576_s29 = sshll.u32 %s737_s28, 10 }
  0x18   : > { %312 = vst [vmem:[#allocation7 + $0x8] sm:$0xff] %v575_v2  ;;  %p314_p8 = scmp.lt.s32.totalorder %s313_s27, 0  ;;  %v323_v5 = vstv %s576_s29  ;;  %s282_s8 = scalar_lea.vmem %s807_s1, %s570_s11 }
  0x19   : > { %v324_v6 = vadd.s32 %v323_v5, %v322_v3 }
  0x1a   : > { %s315_s9 = scalar_select %p314_p8, 0, 255 }
  0x1b   : > { %vm325_vm1 = vcmp.lt.s32.totalorder %v324_v6, 2500  ;;  %333 = sbr.rel (%p577_p9) target bundleno = 35 (0x23), region = 32 }
  0x1c   : > { %v316_v7 = vld [vmem:[%s282_s8] sm:%s315_s9] }
  0x1d   : > { %v320_v8 = vsel %vm319_vm0, %v11_v0, %v316_v7 }
  0x1e   : > { %v326_v9 = vsel %vm325_vm1, %v320_v8, %v11_v0 }
  0x1f   : > { %329 = vst [vmem:[#allocation8] sm:$0xff] %v326_v9 }
  0x20   : > { %v669_v10 = vmov 0.0  }
  0x21   : > { %334 = vst [vmem:[%s749_s14] sm:$0x3] %v669_v10  ;;  %335 = vst [vmem:[%s754_s17] sm:$0x3] %v669_v10 }
  0x22   : > { %336 = vst [vmem:[%s759_s21] sm:$0x3] %v669_v10 }
  0x23 PF: > { %v339_v11 = vshrl.u32 %v322_v3, 7  ;;  %s579_s11 = sshll.u32 %s737_s28, 3  ;;  %v352_v12 = vld [vmem:[#allocation7] sm:$0xff]  ;;  %v354_v14 = vld [vmem:[#allocation7 + $0x8] sm:$0xff]  ;;  %v341_v15 = vand.u32 127, %v322_v3  ;;  %v670_v22 = vmov 0.0  }
  0x24   : > { %v345_v13 = vstv %s579_s11  ;;  %v355_v17 = vsub.f32 %v352_v12, %v354_v14  ;;  %vm408_vm7 = vcmask 1040384  }
  0x25   : > { %v346_v16 = vadd.s32 %v345_v13, %v339_v11 }
  0x26   : > { %v356_v20 = vmul.f32 1.442695, %v355_v17 }
  0x27   : > { %v347_v19 = vmul.u32 128, %v346_v16 }
  0x28   : > { %625 = vpow2.f32 %v356_v20  ;;  %v412_v9 = vld [vmem:[%s754_s17] sm:$0x3] }
  0x29   : > { %v337_v18 = vld [vmem:[#allocation8] sm:$0xff]  ;;  %v348_v21 = vadd.s32 %v347_v19, %v341_v15  ;;  %v416_v39 = vld [vmem:[%s759_s21] sm:$0x3] }
  0x2a   : > { %vm361_vm2 = vcmp.eq.s32.totalorder %v337_v18, 0  ;;  %vm384_vm3 = vcmp.eq.s32.totalorder %v337_v18, 1  ;;  %v407_v11 = vld [vmem:[%s749_s14] sm:$0x3] }
  0x2b   : > { %vm349_vm4 = vcmp.lt.s32.totalorder %v348_v21, 2500 }
  0x2c   : > { %vm362_vm5 = vmand %vm361_vm2, %vm349_vm4  ;;  %v580_v42 = vsel %vm349_vm4, 1.0, %v670_v22 }
  0x2d   : > { %v363_v23 = vsel %vm362_vm5, 1.0, %v670_v22  ;;  %vm385_vm6 = vmand %vm384_vm3, %vm349_vm4 }
  0x2e   : > { %v378_v24 = vrot.slane %v363_v23, 4  ;;  %v386_v25 = vsel %vm385_vm6, 1.0, %v670_v22 }
  0x2f   : > { %v401_v26 = vrot.slane %v386_v25, 4 }
  0x30   : > { %v379_v27 = vadd.f32 %v378_v24, %v363_v23 }
  0x31   : > { %v402_v28 = vadd.f32 %v401_v26, %v386_v25 }
  0x32   : > { %v380_v29 = vrot.slane %v379_v27, 2 }
  0x33   : > { %v403_v30 = vrot.slane %v402_v28, 2 }
  0x34   : > { %v381_v31 = vadd.f32 %v380_v29, %v379_v27 }
  0x35   : > { %v404_v32 = vadd.f32 %v403_v30, %v402_v28  ;;  %v626_v33 = vpop.eup %625 }
  0x36   : > { %v382_v34 = vrot.slane %v381_v31, 1  ;;  %v358_v35 = vadd.f32 1.0, %v626_v33 }
  0x37   : > { %v405_v36 = vrot.slane %v404_v32, 1 }
  0x38   : > { %v383_v37 = vadd.f32 %v382_v34, %v381_v31  ;;  %627 = vrcp.f32 %v358_v35 }
  0x39   : > { %v406_v38 = vadd.f32 %v405_v36, %v404_v32 }
  0x3b   : > { %v417_v40 = vsel %vm408_vm7, %v383_v37, %v406_v38 }
  0x3c   : > { %v418_v41 = vadd.f32 %v417_v40, %v416_v39 }
  0x3e   : > { %419 = vst [vmem:[%s759_s21] sm:$0x3] %v418_v41 }
  0x45   : > { %v628_v43 = vpop.eup %627 }
  0x46   : > { %v360_v44 = vsub.f32 1.0, %v628_v43  ;;  %v387_v45 = vmul.f32 %v628_v43, %v580_v42 }
  0x48   : > { %v364_v46 = vmul.f32 %v580_v42, %v360_v44  ;;  %v388_v47 = vmul.f32 %v387_v45, %v386_v25  ;;  %v395_v48 = vrot.slane %v387_v45, 4 }
  0x4a   : > { %v365_v49 = vmul.f32 %v364_v46, %v363_v23  ;;  %v372_v50 = vrot.slane %v364_v46, 4  ;;  %v389_v51 = vrot.slane %v388_v47, 4  ;;  %v396_v52 = vadd.f32 %v395_v48, %v387_v45 }
  0x4c   : > { %v366_v53 = vrot.slane %v365_v49, 4  ;;  %v373_v54 = vadd.f32 %v372_v50, %v364_v46  ;;  %v390_v55 = vadd.f32 %v389_v51, %v388_v47  ;;  %v397_v56 = vrot.slane %v396_v52, 2 }
  0x4e   : > { %v367_v57 = vadd.f32 %v366_v53, %v365_v49  ;;  %v374_v58 = vrot.slane %v373_v54, 2  ;;  %v391_v59 = vrot.slane %v390_v55, 2  ;;  %v398_v60 = vadd.f32 %v397_v56, %v396_v52 }
  0x50   : > { %v368_v61 = vrot.slane %v367_v57, 2  ;;  %v375_v62 = vadd.f32 %v374_v58, %v373_v54  ;;  %v392_v63 = vadd.f32 %v391_v59, %v390_v55  ;;  %v399_v1 = vrot.slane %v398_v60, 1 }
  0x52   : > { %v369_v2 = vadd.f32 %v368_v61, %v367_v57  ;;  %v376_v3 = vrot.slane %v375_v62, 1  ;;  %v393_v4 = vrot.slane %v392_v63, 1  ;;  %v400_v5 = vadd.f32 %v399_v1, %v398_v60 }
  0x54   : > { %v370_v6 = vrot.slane %v369_v2, 1  ;;  %v377_v7 = vadd.f32 %v376_v3, %v375_v62  ;;  %v394_v8 = vadd.f32 %v393_v4, %v392_v63 }
  0x56   : > { %v371_v10 = vadd.f32 %v370_v6, %v369_v2  ;;  %v413_v12 = vsel %vm408_vm7, %v377_v7, %v400_v5 }
  0x57   : > { %v414_v13 = vadd.f32 %v413_v12, %v412_v9 }
  0x58   : > { %v409_v14 = vsel %vm408_vm7, %v371_v10, %v394_v8 }
  0x59   : > { %v410_v15 = vadd.f32 %v409_v14, %v407_v11  ;;  %415 = vst [vmem:[%s754_s17] sm:$0x3] %v414_v13 }
  0x5b   : > { %411 = vst [vmem:[%s749_s14] sm:$0x3] %v410_v15 }
  0x5c PF: > { %s17_s24 = sadd.s32 1, %s667_s24   ;;  %s812_s20 = smov %s659_s22 }
  0x5d   : > { %p14_p10 = scmp.ge.s32.totalorder %s17_s24, 6   ;;  %s813_s21 = smov %s663_s23 }
  0x5e   : > { %s814_s22 = smov %s817_s25  ;;  %s815_s23 = smov %s821_s26 }
  0x5f   :  { %16 = sbr.rel (!%p14_p10) target bundleno = 3 (0x3), region = 92 }

</bundles_post_ra>
